<compile_context>
chip_gen: v6e
topology: v6e:2x2x1
jax: 0.10.0
libtpu: 0.0.40
codegen_flags: <defaults>
</compile_context>

<pallas_src>
import functools

import jax
import jax.numpy as jnp
from jax.experimental import pallas as pl
from jax.experimental.pallas import tpu as pltpu


# ---------------------------------------------------------------------------
# Model dimensions
# ---------------------------------------------------------------------------
N_FEAT = 8
FILTERS = [32, 32, 32]
NUM_LAYERS = len(FILTERS)
FILT = FILTERS[0]                       # all filters are 32
REDUCTION = 2
CHANNEL_DIM = sum(FILTERS)              # 96
HIDDEN = CHANNEL_DIM // REDUCTION       # 48
SCORE_HIDDEN = 16
OUT_LANES = 128                         # lane-dense output slab width
B_PAD = 8                               # padded per-side graph count (sublane tile)


# ---------------------------------------------------------------------------
# Fused Pallas kernel: whole GSC forward, all intermediates resident in VMEM
# ---------------------------------------------------------------------------
def gsc_fused_kernel(a_ref, x_ref, p_ref,
                     w_ref, b_ref,
                     csw1_ref, csw2_ref, csb_ref,
                     scw1_ref, schead_ref,
                     out_ref, *, b_pad):
    # a_ref     : [2N, 2N]      block-diag D^-1/2(A+I)D^-1/2 for both graph batches
    # x_ref     : [2N, 32]      stacked node features (zero-padded to 32 cols)
    # p_ref     : [2*b_pad, 2N] block-diag global_add_pool matrix (rows zero-padded)
    # w_ref     : [3, 3, 32, 32] per-layer weights; w_ref[i, 0/1/2] = gcn / inner / outer
    # b_ref     : [3, 3, 32]    per-layer biases (row 0: gcn, 1: inner, 2: outer)
    # csw1_ref  : [3, 32, 48]   conv_stack Linear(96,48) split into per-layer row blocks
    # csw2_ref  : [48, 48]      conv_stack Linear(48,48)
    # csb_ref   : [2, 48]       conv_stack biases (row 0: b1, row 1: b2)
    # scw1_ref  : [48, 16]      score Linear(48,16)
    # schead_ref: [3, 16]       row 0: sc_b1, row 1: sc_w2^T, row 2: sc_b2 (bcast)
    a = a_ref[...]
    p = p_ref[...]
    c = x_ref[...]

    # conv_stack first-layer pre-activation, accumulated across GCN levels
    h_pre = jnp.zeros((b_pad, HIDDEN), jnp.float32)

    for i in range(NUM_LAYERS):                          # static unroll (3)
        b_lay = b_ref[i]                                 # [3, 32]
        # convolutional_pass_level: GCNConv -> ReLU (dropout = identity, eval)
        h = jnp.dot(c, w_ref[i, 0], preferred_element_type=jnp.float32)
        c = jnp.maximum(
            jnp.dot(a, h, preferred_element_type=jnp.float32) + b_lay[0:1, :],
            0.0)
        # deepsets inner MLP + ReLU
        inner = jnp.maximum(
            jnp.dot(c, w_ref[i, 1], preferred_element_type=jnp.float32)
            + b_lay[1:2, :], 0.0)
        # global_add_pool for both graph batches at once  -> [2*b_pad, 32]
        pooled = jnp.dot(p, inner, preferred_element_type=jnp.float32)
        # deepsets outer MLP + ReLU
        outer = jnp.maximum(
            jnp.dot(pooled, w_ref[i, 2], preferred_element_type=jnp.float32)
            + b_lay[2:3, :], 0.0)
        # fuse_type='cat': diff block, split at the sublane-aligned boundary
        d = outer[:b_pad, :] - outer[b_pad:, :]
        diff = jnp.exp(-(d * d))                         # [b_pad, 32]
        # accumulate conv_stack Linear(96,48) contribution (no lane-concat)
        h_pre = h_pre + jnp.dot(diff, csw1_ref[i],
                                preferred_element_type=jnp.float32)

    # conv_stack: (+b1) -> ReLU -> Linear(48,48) -> (+b2) -> Tanh
    h = jnp.maximum(h_pre + csb_ref[0:1, :], 0.0)
    h = jnp.tanh(
        jnp.dot(h, csw2_ref[...], preferred_element_type=jnp.float32)
        + csb_ref[1:2, :])

    # score_layer: Linear(48,16) -> ReLU -> Linear(16,1) -> sigmoid
    s = jnp.maximum(
        jnp.dot(h, scw1_ref[...], preferred_element_type=jnp.float32)
        + schead_ref[0:1, :], 0.0)
    # final Linear(16,1) as VPU mul + lane reduce (no 1-lane MXU matmul)
    score = (jnp.sum(s * schead_ref[1:2, :], axis=-1, keepdims=True)
             + schead_ref[2:3, 0:1])
    score = jax.nn.sigmoid(score)                        # [b_pad, 1]

    # lane-dense, full-vreg store: broadcast score across the 128-lane slab
    out_ref[...] = jnp.broadcast_to(score, out_ref.shape)


def gsc_forward(a_bd, x_pad, pool_bd, packed_params, num_graphs):
    vmem = pl.BlockSpec(memory_space=pltpu.MemorySpace.VMEM)
    n_inputs = 3 + len(packed_params)
    out = pl.pallas_call(
        functools.partial(gsc_fused_kernel, b_pad=B_PAD),
        out_shape=jax.ShapeDtypeStruct((B_PAD, OUT_LANES), jnp.float32),
        in_specs=[vmem] * n_inputs,
        out_specs=vmem,
    )(a_bd, x_pad, pool_bd, *packed_params)
    return out[:num_graphs, 0]                           # [B]


# ---------------------------------------------------------------------------
# Parameters
# ---------------------------------------------------------------------------
def glorot(key, shape):
    lim = jnp.sqrt(6.0 / (shape[0] + shape[1]))
    return jax.random.uniform(key, shape, jnp.float32, -lim, lim)


def init_params(key):
    keys = iter(jax.random.split(key, 64))
    p = {"gcn_w": [], "gcn_b": [], "wi": [], "bi": [], "wo": [], "bo": []}
    dims_in = [N_FEAT] + FILTERS[:-1]
    for i in range(NUM_LAYERS):
        p["gcn_w"].append(glorot(next(keys), (dims_in[i], FILTERS[i])))
        p["gcn_b"].append(jnp.zeros((1, FILTERS[i]), jnp.float32))
        p["wi"].append(glorot(next(keys), (FILTERS[i], FILTERS[i])))
        p["bi"].append(0.01 * jax.random.normal(next(keys), (1, FILTERS[i]), jnp.float32))
        p["wo"].append(glorot(next(keys), (FILTERS[i], FILTERS[i])))
        p["bo"].append(0.01 * jax.random.normal(next(keys), (1, FILTERS[i]), jnp.float32))
    # conv_stack (cat): Linear(96,48) / Linear(48,48)
    p["cs_w1"] = glorot(next(keys), (CHANNEL_DIM, HIDDEN))
    p["cs_b1"] = jnp.zeros((1, HIDDEN), jnp.float32)
    p["cs_w2"] = glorot(next(keys), (HIDDEN, HIDDEN))
    p["cs_b2"] = jnp.zeros((1, HIDDEN), jnp.float32)
    # score_layer: Linear(48,16) / Linear(16,1)
    p["sc_w1"] = glorot(next(keys), (HIDDEN, SCORE_HIDDEN))
    p["sc_b1"] = jnp.zeros((1, SCORE_HIDDEN), jnp.float32)
    p["sc_w2"] = glorot(next(keys), (SCORE_HIDDEN, 1))
    p["sc_b2"] = jnp.zeros((1, 1), jnp.float32)
    return p


def pack_params(p):
    # Zero-pad layer-0 GCN weight [8,32] -> [32,32] (features are zero-padded
    # to 32 columns, so the product is unchanged); stack all nine per-layer
    # weight matrices into one [3, 3, 32, 32] slab: [layer, {gcn,inner,outer}].
    wg0 = jnp.zeros((FILT, FILT), jnp.float32).at[:N_FEAT, :].set(p["gcn_w"][0])
    gcn_ws = [wg0] + [p["gcn_w"][i] for i in range(1, NUM_LAYERS)]
    w_all = jnp.stack([jnp.stack([gcn_ws[i], p["wi"][i], p["wo"][i]])
                       for i in range(NUM_LAYERS)])              # [3, 3, 32, 32]
    b_all = jnp.stack([
        jnp.concatenate([p["gcn_b"][i], p["bi"][i], p["bo"][i]], axis=0)
        for i in range(NUM_LAYERS)])                             # [3, 3, 32]
    # conv_stack Linear(96,48) split into per-layer row blocks -> no in-kernel concat
    cs_w1_split = p["cs_w1"].reshape(NUM_LAYERS, FILT, HIDDEN)   # [3, 32, 48]
    cs_b = jnp.concatenate([p["cs_b1"], p["cs_b2"]], axis=0)     # [2, 48]
    # score head: row 0 = sc_b1, row 1 = sc_w2^T, row 2 = sc_b2 broadcast
    sc_head = jnp.concatenate(
        [p["sc_b1"], p["sc_w2"].T,
         jnp.broadcast_to(p["sc_b2"], (1, SCORE_HIDDEN))], axis=0)  # [3, 16]
    return (w_all, b_all, cs_w1_split, p["cs_w2"], cs_b, p["sc_w1"], sc_head)


# ---------------------------------------------------------------------------
# Graph glue: normalized adjacency, pooling matrix, block-diag batching
# ---------------------------------------------------------------------------
def build_norm_adj(edge_index, num_nodes):
    # Dense D^-1/2 (A + I) D^-1/2 (GCNConv normalization, unit edge weights,
    # self-loops added). edge_index is [2, E], messages flow src -> dst.
    a = jnp.zeros((num_nodes, num_nodes), jnp.float32)
    a = a.at[edge_index[1], edge_index[0]].set(1.0)
    a = a + jnp.eye(num_nodes, dtype=jnp.float32)
    deg = a.sum(axis=1)
    dinv = jnp.where(deg > 0, 1.0 / jnp.sqrt(deg), 0.0)
    return a * dinv[:, None] * dinv[None, :]


def build_pool_matrix(batch_vec, num_graphs):
    # P[b, n] = 1 if node n belongs to graph b  (global_add_pool = P @ H)
    return jax.nn.one_hot(batch_vec, num_graphs, dtype=jnp.float32).T


def block_diag2(m1, m2):
    r1, c1 = m1.shape
    r2, c2 = m2.shape
    top = jnp.concatenate([m1, jnp.zeros((r1, c2), m1.dtype)], axis=1)
    bot = jnp.concatenate([jnp.zeros((r2, c1), m2.dtype), m2], axis=1)
    return jnp.concatenate([top, bot], axis=0)


def pad_rows(m, rows):
    r, c = m.shape
    return jnp.zeros((rows, c), m.dtype).at[:r, :].set(m)


def pad_features(x, width):
    n, f = x.shape
    return jnp.zeros((n, width), jnp.float32).at[:, :f].set(x)


# ---------------------------------------------------------------------------
# Pure-JAX reference (same math, per-graph-batch) for correctness check
# ---------------------------------------------------------------------------
def gsc_forward_ref(a1, a2, x1, x2, p1, p2, params):
    c1, c2 = x1, x2
    diffs = []
    for i in range(NUM_LAYERS):
        c1 = jax.nn.relu(a1 @ (c1 @ params["gcn_w"][i]) + params["gcn_b"][i])
        c2 = jax.nn.relu(a2 @ (c2 @ params["gcn_w"][i]) + params["gcn_b"][i])
        i1 = jax.nn.relu(c1 @ params["wi"][i] + params["bi"][i])
        i2 = jax.nn.relu(c2 @ params["wi"][i] + params["bi"][i])
        o1 = jax.nn.relu((p1 @ i1) @ params["wo"][i] + params["bo"][i])
        o2 = jax.nn.relu((p2 @ i2) @ params["wo"][i] + params["bo"][i])
        diffs.append(jnp.exp(-(o1 - o2) ** 2))
    diff = jnp.concatenate(diffs, axis=1)
    h = jax.nn.relu(diff @ params["cs_w1"] + params["cs_b1"])
    h = jnp.tanh(h @ params["cs_w2"] + params["cs_b2"])
    s = jax.nn.relu(h @ params["sc_w1"] + params["sc_b1"])
    s = s @ params["sc_w2"] + params["sc_b2"]
    return jax.nn.sigmoid(s).reshape(-1)


def ring_edges(offsets, nodes_per_graph):
    src, dst = [], []
    for off in offsets:
        for k in range(nodes_per_graph):
            a, b = off + k, off + (k + 1) % nodes_per_graph
            src += [a, b]
            dst += [b, a]
        # a chord to break symmetry
        a, b = off, off + nodes_per_graph // 2
        src += [a, b]
        dst += [b, a]
    return jnp.array([src, dst], dtype=jnp.int32)


if __name__ == "__main__":
    key = jax.random.PRNGKey(0)
    k_par, k_x1, k_x2 = jax.random.split(key, 3)

    num_graphs = 2
    nodes_per_graph = 8
    n1 = n2 = num_graphs * nodes_per_graph           # 16 nodes per graph-batch

    features_1 = jax.random.normal(k_x1, (n1, N_FEAT), jnp.float32)
    features_2 = jax.random.normal(k_x2, (n2, N_FEAT), jnp.float32)
    batch_1 = jnp.repeat(jnp.arange(num_graphs), nodes_per_graph)
    batch_2 = jnp.repeat(jnp.arange(num_graphs), nodes_per_graph)
    edge_index_1 = ring_edges([0, nodes_per_graph], nodes_per_graph)
    edge_index_2 = ring_edges([0, nodes_per_graph], nodes_per_graph)

    a_hat_1 = build_norm_adj(edge_index_1, n1)
    a_hat_2 = build_norm_adj(edge_index_2, n2)
    pool_1 = build_pool_matrix(batch_1, num_graphs)
    pool_2 = build_pool_matrix(batch_2, num_graphs)

    params = init_params(k_par)

    # --- pack inputs for the fused kernel -------------------------------
    a_bd = block_diag2(a_hat_1, a_hat_2)                     # [2N, 2N]
    x_pad = pad_features(jnp.concatenate([features_1, features_2], axis=0),
                         FILT)                               # [2N, 32]
    # zero-pad per-side graph count to B_PAD rows so the kernel's graph1/graph2
    # split is sublane-aligned and the output store is a full (8,128) vreg
    pool_bd = block_diag2(pad_rows(pool_1, B_PAD),
                          pad_rows(pool_2, B_PAD))           # [2*B_PAD, 2N]
    packed = pack_params(params)

    score = gsc_forward(a_bd, x_pad, pool_bd, packed, num_graphs)
    score = jax.block_until_ready(score)

    # correctness vs. pure-JAX reference of the same forward
    score_ref = jax.block_until_ready(
        gsc_forward_ref(a_hat_1, a_hat_2, features_1, features_2,
                        pool_1, pool_2, params))

    assert score.shape == (num_graphs,)
    assert bool(jnp.all(jnp.isfinite(score)))
    assert bool(jnp.all((score >= 0.0) & (score <= 1.0)))
    assert bool(jnp.allclose(score, score_ref, atol=1e-5, rtol=1e-5))
    print("KERNEL_OK")
</pallas_src>

<mosaic_0001>
module attributes {stable_mosaic.version = 11 : i64} {
  func.func @gsc_fused_kernel(%arg0: memref<32x32xf32, #tpu.memory_space<vmem>>, %arg1: memref<32x32xf32, #tpu.memory_space<vmem>>, %arg2: memref<16x32xf32, #tpu.memory_space<vmem>>, %arg3: memref<3x3x32x32xf32, #tpu.memory_space<vmem>>, %arg4: memref<3x3x32xf32, #tpu.memory_space<vmem>>, %arg5: memref<3x32x48xf32, #tpu.memory_space<vmem>>, %arg6: memref<48x48xf32, #tpu.memory_space<vmem>>, %arg7: memref<2x48xf32, #tpu.memory_space<vmem>>, %arg8: memref<48x16xf32, #tpu.memory_space<vmem>>, %arg9: memref<3x16xf32, #tpu.memory_space<vmem>>, %arg10: memref<8x128xf32, #tpu.memory_space<vmem>>) attributes {dimension_semantics = [], scalar_prefetch = 0 : i64, scratch_operands = 0 : i64, tpu.core_type = #tpu.core_type<tc>} {
    %c0 = arith.constant 0 : index
    %c0_0 = arith.constant 0 : index
    %0 = vector.load %arg0[%c0, %c0_0] : memref<32x32xf32, #tpu.memory_space<vmem>>, vector<32x32xf32>
    %c0_1 = arith.constant 0 : index
    %c0_2 = arith.constant 0 : index
    %1 = vector.load %arg2[%c0_1, %c0_2] : memref<16x32xf32, #tpu.memory_space<vmem>>, vector<16x32xf32>
    %c0_3 = arith.constant 0 : index
    %c0_4 = arith.constant 0 : index
    %2 = vector.load %arg1[%c0_3, %c0_4] : memref<32x32xf32, #tpu.memory_space<vmem>>, vector<32x32xf32>
    %cst = arith.constant 0.000000e+00 : f32
    %3 = vector.broadcast %cst : f32 to vector<8x48xf32>
    %c0_5 = arith.constant 0 : index
    %c0_6 = arith.constant 0 : index
    %c0_7 = arith.constant 0 : index
    %4 = vector.load %arg4[%c0_5, %c0_6, %c0_7] : memref<3x3x32xf32, #tpu.memory_space<vmem>>, vector<1x3x32xf32>
    %5 = vector.shape_cast %4 : vector<1x3x32xf32> to vector<3x32xf32>
    %c0_8 = arith.constant 0 : index
    %c0_9 = arith.constant 0 : index
    %c0_10 = arith.constant 0 : index
    %c0_11 = arith.constant 0 : index
    %6 = vector.load %arg3[%c0_8, %c0_9, %c0_10, %c0_11] : memref<3x3x32x32xf32, #tpu.memory_space<vmem>>, vector<1x1x32x32xf32>
    %7 = vector.shape_cast %6 : vector<1x1x32x32xf32> to vector<32x32xf32>
    %cst_12 = arith.constant dense<0.000000e+00> : vector<32x32xf32>
    %8 = tpu.matmul %2, %7, %cst_12 {dimension_numbers = #tpu.dot_dimension_numbers<[1], [0], [0], [1], [0, 0, 1, 1], [], []>} : vector<32x32xf32>, vector<32x32xf32>, vector<32x32xf32> -> vector<32x32xf32>
    %cst_13 = arith.constant dense<0.000000e+00> : vector<32x32xf32>
    %9 = tpu.matmul %0, %8, %cst_13 {dimension_numbers = #tpu.dot_dimension_numbers<[1], [0], [0], [1], [0, 0, 1, 1], [], []>} : vector<32x32xf32>, vector<32x32xf32>, vector<32x32xf32> -> vector<32x32xf32>
    %10 = vector.extract_strided_slice %5 {offsets = [0, 0], sizes = [1, 32], strides = [1, 1]} : vector<3x32xf32> to vector<1x32xf32>
    %11 = vector.broadcast %10 : vector<1x32xf32> to vector<32x32xf32>
    %12 = arith.addf %9, %11 : vector<32x32xf32>
    %cst_14 = arith.constant 0.000000e+00 : f32
    %13 = vector.broadcast %cst_14 : f32 to vector<32x32xf32>
    %14 = arith.maximumf %12, %13 : vector<32x32xf32>
    %c0_15 = arith.constant 0 : index
    %c1 = arith.constant 1 : index
    %c0_16 = arith.constant 0 : index
    %c0_17 = arith.constant 0 : index
    %15 = vector.load %arg3[%c0_15, %c1, %c0_16, %c0_17] : memref<3x3x32x32xf32, #tpu.memory_space<vmem>>, vector<1x1x32x32xf32>
    %16 = vector.shape_cast %15 : vector<1x1x32x32xf32> to vector<32x32xf32>
    %cst_18 = arith.constant dense<0.000000e+00> : vector<32x32xf32>
    %17 = tpu.matmul %14, %16, %cst_18 {dimension_numbers = #tpu.dot_dimension_numbers<[1], [0], [0], [1], [0, 0, 1, 1], [], []>} : vector<32x32xf32>, vector<32x32xf32>, vector<32x32xf32> -> vector<32x32xf32>
    %18 = vector.extract_strided_slice %5 {offsets = [1, 0], sizes = [1, 32], strides = [1, 1]} : vector<3x32xf32> to vector<1x32xf32>
    %19 = vector.broadcast %18 : vector<1x32xf32> to vector<32x32xf32>
    %20 = arith.addf %17, %19 : vector<32x32xf32>
    %cst_19 = arith.constant 0.000000e+00 : f32
    %21 = vector.broadcast %cst_19 : f32 to vector<32x32xf32>
    %22 = arith.maximumf %20, %21 : vector<32x32xf32>
    %cst_20 = arith.constant dense<0.000000e+00> : vector<16x32xf32>
    %23 = tpu.matmul %1, %22, %cst_20 {dimension_numbers = #tpu.dot_dimension_numbers<[1], [0], [0], [1], [0, 0, 1, 1], [], []>} : vector<16x32xf32>, vector<32x32xf32>, vector<16x32xf32> -> vector<16x32xf32>
    %c0_21 = arith.constant 0 : index
    %c2 = arith.constant 2 : index
    %c0_22 = arith.constant 0 : index
    %c0_23 = arith.constant 0 : index
    %24 = vector.load %arg3[%c0_21, %c2, %c0_22, %c0_23] : memref<3x3x32x32xf32, #tpu.memory_space<vmem>>, vector<1x1x32x32xf32>
    %25 = vector.shape_cast %24 : vector<1x1x32x32xf32> to vector<32x32xf32>
    %cst_24 = arith.constant dense<0.000000e+00> : vector<16x32xf32>
    %26 = tpu.matmul %23, %25, %cst_24 {dimension_numbers = #tpu.dot_dimension_numbers<[1], [0], [0], [1], [0, 0, 1, 1], [], []>} : vector<16x32xf32>, vector<32x32xf32>, vector<16x32xf32> -> vector<16x32xf32>
    %27 = vector.extract_strided_slice %5 {offsets = [2, 0], sizes = [1, 32], strides = [1, 1]} : vector<3x32xf32> to vector<1x32xf32>
    %28 = vector.broadcast %27 : vector<1x32xf32> to vector<16x32xf32>
    %29 = arith.addf %26, %28 : vector<16x32xf32>
    %cst_25 = arith.constant 0.000000e+00 : f32
    %30 = vector.broadcast %cst_25 : f32 to vector<16x32xf32>
    %31 = arith.maximumf %29, %30 : vector<16x32xf32>
    %32 = vector.extract_strided_slice %31 {offsets = [0, 0], sizes = [8, 32], strides = [1, 1]} : vector<16x32xf32> to vector<8x32xf32>
    %33 = vector.extract_strided_slice %31 {offsets = [8, 0], sizes = [8, 32], strides = [1, 1]} : vector<16x32xf32> to vector<8x32xf32>
    %34 = arith.subf %32, %33 : vector<8x32xf32>
    %35 = arith.mulf %34, %34 : vector<8x32xf32>
    %cst_26 = arith.constant 0.000000e+00 : f32
    %36 = vector.broadcast %cst_26 : f32 to vector<8x32xf32>
    %37 = arith.subf %36, %35 : vector<8x32xf32>
    %38 = math.exp %37 : vector<8x32xf32>
    %c0_27 = arith.constant 0 : index
    %c0_28 = arith.constant 0 : index
    %c0_29 = arith.constant 0 : index
    %39 = vector.load %arg5[%c0_27, %c0_28, %c0_29] : memref<3x32x48xf32, #tpu.memory_space<vmem>>, vector<1x32x48xf32>
    %40 = vector.shape_cast %39 : vector<1x32x48xf32> to vector<32x48xf32>
    %cst_30 = arith.constant dense<0.000000e+00> : vector<8x48xf32>
    %41 = tpu.matmul %38, %40, %cst_30 {dimension_numbers = #tpu.dot_dimension_numbers<[1], [0], [0], [1], [0, 0, 1, 1], [], []>} : vector<8x32xf32>, vector<32x48xf32>, vector<8x48xf32> -> vector<8x48xf32>
    %42 = arith.addf %3, %41 : vector<8x48xf32>
    %c1_31 = arith.constant 1 : index
    %c0_32 = arith.constant 0 : index
    %c0_33 = arith.constant 0 : index
    %43 = vector.load %arg4[%c1_31, %c0_32, %c0_33] : memref<3x3x32xf32, #tpu.memory_space<vmem>>, vector<1x3x32xf32>
    %44 = vector.shape_cast %43 : vector<1x3x32xf32> to vector<3x32xf32>
    %c1_34 = arith.constant 1 : index
    %c0_35 = arith.constant 0 : index
    %c0_36 = arith.constant 0 : index
    %c0_37 = arith.constant 0 : index
    %45 = vector.load %arg3[%c1_34, %c0_35, %c0_36, %c0_37] : memref<3x3x32x32xf32, #tpu.memory_space<vmem>>, vector<1x1x32x32xf32>
    %46 = vector.shape_cast %45 : vector<1x1x32x32xf32> to vector<32x32xf32>
    %cst_38 = arith.constant dense<0.000000e+00> : vector<32x32xf32>
    %47 = tpu.matmul %14, %46, %cst_38 {dimension_numbers = #tpu.dot_dimension_numbers<[1], [0], [0], [1], [0, 0, 1, 1], [], []>} : vector<32x32xf32>, vector<32x32xf32>, vector<32x32xf32> -> vector<32x32xf32>
    %cst_39 = arith.constant dense<0.000000e+00> : vector<32x32xf32>
    %48 = tpu.matmul %0, %47, %cst_39 {dimension_numbers = #tpu.dot_dimension_numbers<[1], [0], [0], [1], [0, 0, 1, 1], [], []>} : vector<32x32xf32>, vector<32x32xf32>, vector<32x32xf32> -> vector<32x32xf32>
    %49 = vector.extract_strided_slice %44 {offsets = [0, 0], sizes = [1, 32], strides = [1, 1]} : vector<3x32xf32> to vector<1x32xf32>
    %50 = vector.broadcast %49 : vector<1x32xf32> to vector<32x32xf32>
    %51 = arith.addf %48, %50 : vector<32x32xf32>
    %cst_40 = arith.constant 0.000000e+00 : f32
    %52 = vector.broadcast %cst_40 : f32 to vector<32x32xf32>
    %53 = arith.maximumf %51, %52 : vector<32x32xf32>
    %c1_41 = arith.constant 1 : index
    %c1_42 = arith.constant 1 : index
    %c0_43 = arith.constant 0 : index
    %c0_44 = arith.constant 0 : index
    %54 = vector.load %arg3[%c1_41, %c1_42, %c0_43, %c0_44] : memref<3x3x32x32xf32, #tpu.memory_space<vmem>>, vector<1x1x32x32xf32>
    %55 = vector.shape_cast %54 : vector<1x1x32x32xf32> to vector<32x32xf32>
    %cst_45 = arith.constant dense<0.000000e+00> : vector<32x32xf32>
    %56 = tpu.matmul %53, %55, %cst_45 {dimension_numbers = #tpu.dot_dimension_numbers<[1], [0], [0], [1], [0, 0, 1, 1], [], []>} : vector<32x32xf32>, vector<32x32xf32>, vector<32x32xf32> -> vector<32x32xf32>
    %57 = vector.extract_strided_slice %44 {offsets = [1, 0], sizes = [1, 32], strides = [1, 1]} : vector<3x32xf32> to vector<1x32xf32>
    %58 = vector.broadcast %57 : vector<1x32xf32> to vector<32x32xf32>
    %59 = arith.addf %56, %58 : vector<32x32xf32>
    %cst_46 = arith.constant 0.000000e+00 : f32
    %60 = vector.broadcast %cst_46 : f32 to vector<32x32xf32>
    %61 = arith.maximumf %59, %60 : vector<32x32xf32>
    %cst_47 = arith.constant dense<0.000000e+00> : vector<16x32xf32>
    %62 = tpu.matmul %1, %61, %cst_47 {dimension_numbers = #tpu.dot_dimension_numbers<[1], [0], [0], [1], [0, 0, 1, 1], [], []>} : vector<16x32xf32>, vector<32x32xf32>, vector<16x32xf32> -> vector<16x32xf32>
    %c1_48 = arith.constant 1 : index
    %c2_49 = arith.constant 2 : index
    %c0_50 = arith.constant 0 : index
    %c0_51 = arith.constant 0 : index
    %63 = vector.load %arg3[%c1_48, %c2_49, %c0_50, %c0_51] : memref<3x3x32x32xf32, #tpu.memory_space<vmem>>, vector<1x1x32x32xf32>
    %64 = vector.shape_cast %63 : vector<1x1x32x32xf32> to vector<32x32xf32>
    %cst_52 = arith.constant dense<0.000000e+00> : vector<16x32xf32>
    %65 = tpu.matmul %62, %64, %cst_52 {dimension_numbers = #tpu.dot_dimension_numbers<[1], [0], [0], [1], [0, 0, 1, 1], [], []>} : vector<16x32xf32>, vector<32x32xf32>, vector<16x32xf32> -> vector<16x32xf32>
    %66 = vector.extract_strided_slice %44 {offsets = [2, 0], sizes = [1, 32], strides = [1, 1]} : vector<3x32xf32> to vector<1x32xf32>
    %67 = vector.broadcast %66 : vector<1x32xf32> to vector<16x32xf32>
    %68 = arith.addf %65, %67 : vector<16x32xf32>
    %cst_53 = arith.constant 0.000000e+00 : f32
    %69 = vector.broadcast %cst_53 : f32 to vector<16x32xf32>
    %70 = arith.maximumf %68, %69 : vector<16x32xf32>
    %71 = vector.extract_strided_slice %70 {offsets = [0, 0], sizes = [8, 32], strides = [1, 1]} : vector<16x32xf32> to vector<8x32xf32>
    %72 = vector.extract_strided_slice %70 {offsets = [8, 0], sizes = [8, 32], strides = [1, 1]} : vector<16x32xf32> to vector<8x32xf32>
    %73 = arith.subf %71, %72 : vector<8x32xf32>
    %74 = arith.mulf %73, %73 : vector<8x32xf32>
    %cst_54 = arith.constant 0.000000e+00 : f32
    %75 = vector.broadcast %cst_54 : f32 to vector<8x32xf32>
    %76 = arith.subf %75, %74 : vector<8x32xf32>
    %77 = math.exp %76 : vector<8x32xf32>
    %c1_55 = arith.constant 1 : index
    %c0_56 = arith.constant 0 : index
    %c0_57 = arith.constant 0 : index
    %78 = vector.load %arg5[%c1_55, %c0_56, %c0_57] : memref<3x32x48xf32, #tpu.memory_space<vmem>>, vector<1x32x48xf32>
    %79 = vector.shape_cast %78 : vector<1x32x48xf32> to vector<32x48xf32>
    %cst_58 = arith.constant dense<0.000000e+00> : vector<8x48xf32>
    %80 = tpu.matmul %77, %79, %cst_58 {dimension_numbers = #tpu.dot_dimension_numbers<[1], [0], [0], [1], [0, 0, 1, 1], [], []>} : vector<8x32xf32>, vector<32x48xf32>, vector<8x48xf32> -> vector<8x48xf32>
    %81 = arith.addf %42, %80 : vector<8x48xf32>
    %c2_59 = arith.constant 2 : index
    %c0_60 = arith.constant 0 : index
    %c0_61 = arith.constant 0 : index
    %82 = vector.load %arg4[%c2_59, %c0_60, %c0_61] : memref<3x3x32xf32, #tpu.memory_space<vmem>>, vector<1x3x32xf32>
    %83 = vector.shape_cast %82 : vector<1x3x32xf32> to vector<3x32xf32>
    %c2_62 = arith.constant 2 : index
    %c0_63 = arith.constant 0 : index
    %c0_64 = arith.constant 0 : index
    %c0_65 = arith.constant 0 : index
    %84 = vector.load %arg3[%c2_62, %c0_63, %c0_64, %c0_65] : memref<3x3x32x32xf32, #tpu.memory_space<vmem>>, vector<1x1x32x32xf32>
    %85 = vector.shape_cast %84 : vector<1x1x32x32xf32> to vector<32x32xf32>
    %cst_66 = arith.constant dense<0.000000e+00> : vector<32x32xf32>
    %86 = tpu.matmul %53, %85, %cst_66 {dimension_numbers = #tpu.dot_dimension_numbers<[1], [0], [0], [1], [0, 0, 1, 1], [], []>} : vector<32x32xf32>, vector<32x32xf32>, vector<32x32xf32> -> vector<32x32xf32>
    %cst_67 = arith.constant dense<0.000000e+00> : vector<32x32xf32>
    %87 = tpu.matmul %0, %86, %cst_67 {dimension_numbers = #tpu.dot_dimension_numbers<[1], [0], [0], [1], [0, 0, 1, 1], [], []>} : vector<32x32xf32>, vector<32x32xf32>, vector<32x32xf32> -> vector<32x32xf32>
    %88 = vector.extract_strided_slice %83 {offsets = [0, 0], sizes = [1, 32], strides = [1, 1]} : vector<3x32xf32> to vector<1x32xf32>
    %89 = vector.broadcast %88 : vector<1x32xf32> to vector<32x32xf32>
    %90 = arith.addf %87, %89 : vector<32x32xf32>
    %cst_68 = arith.constant 0.000000e+00 : f32
    %91 = vector.broadcast %cst_68 : f32 to vector<32x32xf32>
    %92 = arith.maximumf %90, %91 : vector<32x32xf32>
    %c2_69 = arith.constant 2 : index
    %c1_70 = arith.constant 1 : index
    %c0_71 = arith.constant 0 : index
    %c0_72 = arith.constant 0 : index
    %93 = vector.load %arg3[%c2_69, %c1_70, %c0_71, %c0_72] : memref<3x3x32x32xf32, #tpu.memory_space<vmem>>, vector<1x1x32x32xf32>
    %94 = vector.shape_cast %93 : vector<1x1x32x32xf32> to vector<32x32xf32>
    %cst_73 = arith.constant dense<0.000000e+00> : vector<32x32xf32>
    %95 = tpu.matmul %92, %94, %cst_73 {dimension_numbers = #tpu.dot_dimension_numbers<[1], [0], [0], [1], [0, 0, 1, 1], [], []>} : vector<32x32xf32>, vector<32x32xf32>, vector<32x32xf32> -> vector<32x32xf32>
    %96 = vector.extract_strided_slice %83 {offsets = [1, 0], sizes = [1, 32], strides = [1, 1]} : vector<3x32xf32> to vector<1x32xf32>
    %97 = vector.broadcast %96 : vector<1x32xf32> to vector<32x32xf32>
    %98 = arith.addf %95, %97 : vector<32x32xf32>
    %cst_74 = arith.constant 0.000000e+00 : f32
    %99 = vector.broadcast %cst_74 : f32 to vector<32x32xf32>
    %100 = arith.maximumf %98, %99 : vector<32x32xf32>
    %cst_75 = arith.constant dense<0.000000e+00> : vector<16x32xf32>
    %101 = tpu.matmul %1, %100, %cst_75 {dimension_numbers = #tpu.dot_dimension_numbers<[1], [0], [0], [1], [0, 0, 1, 1], [], []>} : vector<16x32xf32>, vector<32x32xf32>, vector<16x32xf32> -> vector<16x32xf32>
    %c2_76 = arith.constant 2 : index
    %c2_77 = arith.constant 2 : index
    %c0_78 = arith.constant 0 : index
    %c0_79 = arith.constant 0 : index
    %102 = vector.load %arg3[%c2_76, %c2_77, %c0_78, %c0_79] : memref<3x3x32x32xf32, #tpu.memory_space<vmem>>, vector<1x1x32x32xf32>
    %103 = vector.shape_cast %102 : vector<1x1x32x32xf32> to vector<32x32xf32>
    %cst_80 = arith.constant dense<0.000000e+00> : vector<16x32xf32>
    %104 = tpu.matmul %101, %103, %cst_80 {dimension_numbers = #tpu.dot_dimension_numbers<[1], [0], [0], [1], [0, 0, 1, 1], [], []>} : vector<16x32xf32>, vector<32x32xf32>, vector<16x32xf32> -> vector<16x32xf32>
    %105 = vector.extract_strided_slice %83 {offsets = [2, 0], sizes = [1, 32], strides = [1, 1]} : vector<3x32xf32> to vector<1x32xf32>
    %106 = vector.broadcast %105 : vector<1x32xf32> to vector<16x32xf32>
    %107 = arith.addf %104, %106 : vector<16x32xf32>
    %cst_81 = arith.constant 0.000000e+00 : f32
    %108 = vector.broadcast %cst_81 : f32 to vector<16x32xf32>
    %109 = arith.maximumf %107, %108 : vector<16x32xf32>
    %110 = vector.extract_strided_slice %109 {offsets = [0, 0], sizes = [8, 32], strides = [1, 1]} : vector<16x32xf32> to vector<8x32xf32>
    %111 = vector.extract_strided_slice %109 {offsets = [8, 0], sizes = [8, 32], strides = [1, 1]} : vector<16x32xf32> to vector<8x32xf32>
    %112 = arith.subf %110, %111 : vector<8x32xf32>
    %113 = arith.mulf %112, %112 : vector<8x32xf32>
    %cst_82 = arith.constant 0.000000e+00 : f32
    %114 = vector.broadcast %cst_82 : f32 to vector<8x32xf32>
    %115 = arith.subf %114, %113 : vector<8x32xf32>
    %116 = math.exp %115 : vector<8x32xf32>
    %c2_83 = arith.constant 2 : index
    %c0_84 = arith.constant 0 : index
    %c0_85 = arith.constant 0 : index
    %117 = vector.load %arg5[%c2_83, %c0_84, %c0_85] : memref<3x32x48xf32, #tpu.memory_space<vmem>>, vector<1x32x48xf32>
    %118 = vector.shape_cast %117 : vector<1x32x48xf32> to vector<32x48xf32>
    %cst_86 = arith.constant dense<0.000000e+00> : vector<8x48xf32>
    %119 = tpu.matmul %116, %118, %cst_86 {dimension_numbers = #tpu.dot_dimension_numbers<[1], [0], [0], [1], [0, 0, 1, 1], [], []>} : vector<8x32xf32>, vector<32x48xf32>, vector<8x48xf32> -> vector<8x48xf32>
    %120 = arith.addf %81, %119 : vector<8x48xf32>
    %c0_87 = arith.constant 0 : index
    %c0_88 = arith.constant 0 : index
    %121 = vector.load %arg7[%c0_87, %c0_88] : memref<2x48xf32, #tpu.memory_space<vmem>>, vector<1x48xf32>
    %122 = vector.broadcast %121 : vector<1x48xf32> to vector<8x48xf32>
    %123 = arith.addf %120, %122 : vector<8x48xf32>
    %cst_89 = arith.constant 0.000000e+00 : f32
    %124 = vector.broadcast %cst_89 : f32 to vector<8x48xf32>
    %125 = arith.maximumf %123, %124 : vector<8x48xf32>
    %c0_90 = arith.constant 0 : index
    %c0_91 = arith.constant 0 : index
    %126 = vector.load %arg6[%c0_90, %c0_91] : memref<48x48xf32, #tpu.memory_space<vmem>>, vector<48x48xf32>
    %cst_92 = arith.constant dense<0.000000e+00> : vector<8x48xf32>
    %127 = tpu.matmul %125, %126, %cst_92 {dimension_numbers = #tpu.dot_dimension_numbers<[1], [0], [0], [1], [0, 0, 1, 1], [], []>} : vector<8x48xf32>, vector<48x48xf32>, vector<8x48xf32> -> vector<8x48xf32>
    %c1_93 = arith.constant 1 : index
    %c0_94 = arith.constant 0 : index
    %128 = vector.load %arg7[%c1_93, %c0_94] : memref<2x48xf32, #tpu.memory_space<vmem>>, vector<1x48xf32>
    %129 = vector.broadcast %128 : vector<1x48xf32> to vector<8x48xf32>
    %130 = arith.addf %127, %129 : vector<8x48xf32>
    %131 = math.tanh %130 : vector<8x48xf32>
    %c0_95 = arith.constant 0 : index
    %c0_96 = arith.constant 0 : index
    %132 = vector.load %arg8[%c0_95, %c0_96] : memref<48x16xf32, #tpu.memory_space<vmem>>, vector<48x16xf32>
    %cst_97 = arith.constant dense<0.000000e+00> : vector<8x16xf32>
    %133 = tpu.matmul %131, %132, %cst_97 {dimension_numbers = #tpu.dot_dimension_numbers<[1], [0], [0], [1], [0, 0, 1, 1], [], []>} : vector<8x48xf32>, vector<48x16xf32>, vector<8x16xf32> -> vector<8x16xf32>
    %c0_98 = arith.constant 0 : index
    %c0_99 = arith.constant 0 : index
    %134 = vector.load %arg9[%c0_98, %c0_99] : memref<3x16xf32, #tpu.memory_space<vmem>>, vector<1x16xf32>
    %135 = vector.broadcast %134 : vector<1x16xf32> to vector<8x16xf32>
    %136 = arith.addf %133, %135 : vector<8x16xf32>
    %cst_100 = arith.constant 0.000000e+00 : f32
    %137 = vector.broadcast %cst_100 : f32 to vector<8x16xf32>
    %138 = arith.maximumf %136, %137 : vector<8x16xf32>
    %c1_101 = arith.constant 1 : index
    %c0_102 = arith.constant 0 : index
    %139 = vector.load %arg9[%c1_101, %c0_102] : memref<3x16xf32, #tpu.memory_space<vmem>>, vector<1x16xf32>
    %140 = vector.broadcast %139 : vector<1x16xf32> to vector<8x16xf32>
    %141 = arith.mulf %138, %140 : vector<8x16xf32>
    %cst_103 = arith.constant dense<0.000000e+00> : vector<8xf32>
    %142 = vector.multi_reduction <add>, %141, %cst_103 [1] : vector<8x16xf32> to vector<8xf32>
    %143 = vector.shape_cast %142 : vector<8xf32> to vector<8x1xf32>
    %c2_104 = arith.constant 2 : index
    %c0_105 = arith.constant 0 : index
    %144 = vector.load %arg9[%c2_104, %c0_105] : memref<3x16xf32, #tpu.memory_space<vmem>>, vector<1x1xf32>
    %145 = vector.broadcast %144 : vector<1x1xf32> to vector<8x1xf32>
    %146 = arith.addf %143, %145 : vector<8x1xf32>
    %147 = arith.negf %146 : vector<8x1xf32>
    %148 = math.exp %147 : vector<8x1xf32>
    %cst_106 = arith.constant 1.000000e+00 : f32
    %149 = vector.broadcast %cst_106 : f32 to vector<8x1xf32>
    %150 = arith.addf %149, %148 : vector<8x1xf32>
    %151 = arith.divf %149, %150 : vector<8x1xf32>
    %152 = vector.shape_cast %151 : vector<8x1xf32> to vector<8x1xf32>
    %153 = vector.broadcast %152 : vector<8x1xf32> to vector<8x128xf32>
    %c0_107 = arith.constant 0 : index
    %c0_108 = arith.constant 0 : index
    %154 = vector.load %arg10[%c0_107, %c0_108] : memref<8x128xf32, #tpu.memory_space<vmem>>, vector<8x128xf32>
    tpu.vector_store %arg10[%c0_107, %c0_108], %153 {strides = array<i32>} : memref<8x128xf32, #tpu.memory_space<vmem>>, vector<8x128xf32>,
    return
  }
}

</mosaic_0001>

<bundles_post_ra>
// kernel: tpu_custom_call.1
= control target key start
LH: loop header
LB: loop body
LE: loop exit
PB: predicated region body
PF: predicated region fallthrough
CT: control target
= control target key end

     0   :  { %15 = vsyncpa [#allocation3], 0  ;;  %s2947_s0 = inlined_call_operand.hbm [shape: f32[32,32], index: 0, kind: input, shape index: {}]   ;;  %s2948_s1 = inlined_call_operand.hbm [shape: f32[32,32], index: 1, kind: input, shape index: {}]   ;;  %s2949_s2 = inlined_call_operand.vmem [shape: f32[16,32], index: 2, kind: input, shape index: {}]   ;;  %s2950_s3 = inlined_call_operand.hbm [shape: f32[3,3,32,32], index: 3, kind: input, shape index: {}]   ;;  %s2951_s4 = inlined_call_operand.hbm [shape: f32[3,3,32], index: 4, kind: input, shape index: {}]   ;;  %s2952_s5 = inlined_call_operand.hbm [shape: f32[3,32,48], index: 5, kind: input, shape index: {}]   ;;  %s2953_s6 = inlined_call_operand.vmem [shape: f32[48,48], index: 6, kind: input, shape index: {}]   ;;  %s2954_s7 = inlined_call_operand.vmem [shape: f32[2,48], index: 7, kind: input, shape index: {}]   ;;  %s2955_s8 = inlined_call_operand.vmem [shape: f32[48,16], index: 8, kind: input, shape index: {}]   ;;  %s2956_s9 = inlined_call_operand.vmem [shape: f32[3,16], index: 9, kind: input, shape index: {}]   ;;  %s2957_s10 = inlined_call_operand.hbm [shape: f32[8,128], index: 10, kind: output, shape index: {}]  }
   0x1   :  { %16 = vsyncpa [#allocation6], 0 }
   0x2   :  { %17 = vsyncpa [#allocation9], 0 }
   0x3   :  { %18 = vsyncpa [#allocation4], 0  ;;  %s2606_s13 = smov [#allocation5]   ;;  %s2607_s15 = smov [#allocation8]  }
   0x4   :  { %s36_s14 = sshll.u32 %s2606_s13, 4  ;;  %s62_s16 = sshll.u32 %s2607_s15, 4  ;;  %s37_s14 = int_to_ptr.vmem [resolvable:$true] %s36_s14  ;;  %s63_s16 = int_to_ptr.vmem [resolvable:$true] %s62_s16 }
   0x5   :  { %s2486_s17 = scalar_lea.vmem %s37_s14, 512  ;;  %p2491_p1 = scmp.lt.s32.totalorder %s37_s14, %s37_s14 }
   0x6   :  { %p2487_p0 = scmp.ne.s32.totalorder %s37_s14, %s2486_s17  ;;  %p2492_p2 = scmp.lt.s32.totalorder %s2486_s17, %s2486_s17 }
   0x8   :  { %p2493_p3 = por %p2492_p2, %p2491_p1 }
   0xa   :  { %p2494_p4 = pnand %p2493_p3, %p2487_p0 }
   0xc   :  { %2497 = shalt.err (!%p2494_p4)
}
   0xd   :  { %s2608_s18 = smov 128   ;;  %s2609_s19 = smov 8  }
   0xe   :  { %42 = dma.hbm_to_vmem [thread:$0]  %s2948_s1, 512, %s37_s14, [#allocation6], %s2608_s18, %s2608_s18, %s2609_s19  }
   0xf   :  { %s2506_s22 = scalar_lea.vmem %s63_s16, 192  ;;  %p2511_p6 = scmp.lt.s32.totalorder %s63_s16, %s63_s16 }
  0x10   :  { %p2507_p5 = scmp.ne.s32.totalorder %s63_s16, %s2506_s22  ;;  %p2512_p7 = scmp.lt.s32.totalorder %s2506_s22, %s2506_s22 }
  0x12   :  { %p2513_p8 = por %p2512_p7, %p2511_p6 }
  0x14   :  { %p2514_p9 = pnand %p2513_p8, %p2507_p5 }
  0x16   :  { %2517 = shalt.err (!%p2514_p9)
}
  0x17   :  { %s2610_s23 = smov 64   ;;  %s2611_s24 = smov 4  }
  0x18   :  { %68 = dma.hbm_to_vmem [thread:$0]  %s2951_s4, 192, %s63_s16, [#allocation9], %s2610_s23, %s2610_s23, %s2611_s24  }
  0x19   :  { %s2612_s27 = smov [#allocation2]   ;;  %s2613_s29 = smov [#allocation7]  }
  0x1a   :  { %s24_s28 = sshll.u32 %s2612_s27, 4  ;;  %s50_s30 = sshll.u32 %s2613_s29, 4  ;;  %s25_s28 = int_to_ptr.vmem [resolvable:$true] %s24_s28  ;;  %s51_s30 = int_to_ptr.vmem [resolvable:$true] %s50_s30 }
  0x1b   :  { %s2526_s1 = scalar_lea.vmem %s25_s28, 512  ;;  %p2531_p11 = scmp.lt.s32.totalorder %s25_s28, %s25_s28 }
  0x1c   :  { %p2527_p10 = scmp.ne.s32.totalorder %s25_s28, %s2526_s1  ;;  %p2532_p12 = scmp.lt.s32.totalorder %s2526_s1, %s2526_s1 }
  0x1e   :  { %p2533_p13 = por %p2532_p12, %p2531_p11 }
  0x20   :  { %p2534_p0 = pnand %p2533_p13, %p2527_p10 }
  0x22   :  { %2537 = shalt.err (!%p2534_p0)
}
  0x23   :  { %30 = dma.hbm_to_vmem [thread:$0]  %s2947_s0, 512, %s25_s28, [#allocation3], %s2608_s18, %s2608_s18, %s2609_s19  }
  0x24   :  { %s2546_s4 = scalar_lea.vmem %s51_s30, 4608  ;;  %p2551_p2 = scmp.lt.s32.totalorder %s51_s30, %s51_s30 }
  0x25   :  { %p2547_p1 = scmp.ne.s32.totalorder %s51_s30, %s2546_s4  ;;  %p2552_p3 = scmp.lt.s32.totalorder %s2546_s4, %s2546_s4 }
  0x27   :  { %p2553_p4 = por %p2552_p3, %p2551_p2 }
  0x29   :  { %p2554_p5 = pnand %p2553_p4, %p2547_p1 }
  0x2b   :  { %2557 = shalt.err (!%p2554_p5)
}
  0x2c   :  { %56 = dma.hbm_to_vmem [thread:$0]  %s2950_s3, 4608, %s51_s30, [#allocation6], %s2608_s18, %s2608_s18, %s2609_s19  }
  0x2d   :  { %s2614_s15 = smov [#allocation10]  }
  0x2e   :  { %s74_s16 = sshll.u32 %s2614_s15, 4  ;;  %s75_s16 = int_to_ptr.vmem [resolvable:$true] %s74_s16 }
  0x2f   :  { %s2566_s17 = scalar_lea.vmem %s75_s16, 1536  ;;  %p2571_p7 = scmp.lt.s32.totalorder %s75_s16, %s75_s16 }
  0x30   :  { %p2567_p6 = scmp.ne.s32.totalorder %s75_s16, %s2566_s17  ;;  %p2572_p8 = scmp.lt.s32.totalorder %s2566_s17, %s2566_s17 }
  0x32   :  { %p2573_p9 = por %p2572_p8, %p2571_p7 }
  0x34   :  { %p2574_p10 = pnand %p2573_p9, %p2567_p6 }
  0x36   :  { %2577 = shalt.err (!%p2574_p10)
}
  0x37   :  { %80 = dma.hbm_to_vmem [thread:$0]  %s2952_s5, 1536, %s75_s16, [#allocation9], %s2608_s18, %s2608_s18, %s2609_s19  }
  0x38   :  { %2598 = dma.done.wait [#allocation3], 512  }
  0x39   :  { %2599 = vsyncadd [#allocation3], 4294966784 }
  0x3a   :  { %2600 = dma.done.wait [#allocation6], 5120  }
  0x3b   :  { %2601 = vsyncadd [#allocation6], 4294962176 }
  0x3c   :  { %2602 = dma.done.wait [#allocation9], 1728  }
  0x3d   :  { %2603 = vsyncadd [#allocation9], 4294965568  ;;  %vm119_vm0 = vcmask 261120   ;;  %v118_v0 = vld [vmem:[#allocation7 + $0x18] sm:$0xff]  ;;  %v117_v1 = vld [vmem:[#allocation7 + $0x10] sm:$0xff]  ;;  %v217_v20 = vlaneseq  ;;  %vm2616_vm1 = vmmov 0  }
  0x3e   :  { %2197 = vmatprep.subr.mxu0 %v118_v0  ;;  %v110_v2 = vld [vmem:[#allocation5] sm:$0xff]  ;;  %v116_v3 = vld [vmem:[#allocation7 + $0x8] sm:$0xff]  ;;  %v112_v6 = vld [vmem:[#allocation5 + $0x10] sm:$0xff]  ;;  %vm1796_vm2 = vcmask 392192   ;;  %vm1962_vm3 = vcmask 130048   ;;  %s2618_s25 = smov [#allocation11]  }
  0x3f   :  { %2198 = vmatpush3.msra.mxu0 %v118_v0  ;;  %2205 = vmatprep.mubr.msk.f32.mxu0 %vm119_vm0, %v110_v2  ;;  %v115_v4 = vld [vmem:[#allocation7] sm:$0xff]  ;;  %v111_v5 = vld [vmem:[#allocation5 + $0x8] sm:$0xff]  ;;  %v113_v7 = vld [vmem:[#allocation5 + $0x18] sm:$0xff]  ;;  %v2721_v21 = vshrl.u32 %v217_v20, 7  ;;  %s1990_s26 = sshll.u32 %s2618_s25, 4  ;;  %s1991_s26 = int_to_ptr.vmem [resolvable:$true] %s1990_s26 }
  0x40   :  { %2199 = vmatprep.subr.mxu0 %v117_v1  ;;  %v2705_v8 = vld [vmem:[#allocation2] sm:$0xff]  ;;  %v2709_v13 = vld [vmem:[#allocation2 + $0x8] sm:$0xff]  ;;  %v2711_v14 = vld [vmem:[#allocation2 + $0x10] sm:$0xff]  ;;  %s2578_s27 = scalar_lea.vmem %s1991_s26, 128  ;;  %p2583_p12 = scmp.lt.s32.totalorder %s1991_s26, %s1991_s26 }
  0x41   :  { %2200 = vmatpush3.msra.mxu0 %v117_v1  ;;  %2219 = vmatprep.mubr.msk.f32.mxu1 %vm119_vm0, %v2705_v8  ;;  %v2717_v15 = vld [vmem:[#allocation2 + $0x18] sm:$0xff]  ;;  %v325_v17 = vld [vmem:[#allocation7 + $0x30] sm:$0xff]  ;;  %v324_v18 = vld [vmem:[#allocation7 + $0x28] sm:$0xff]  ;;  %v2724_v22 = vsub.s32 0, %v2721_v21  ;;  %v2742_v40 = vsub.s32 1, %v2721_v21  ;;  %p2579_p11 = scmp.ne.s32.totalorder %s1991_s26, %s2578_s27  ;;  %p2584_p13 = scmp.lt.s32.totalorder %s2578_s27, %s2578_s27 }
  0x42   :  { %2201 = vmatprep.subr.mxu0 %v116_v3  ;;  %v326_v16 = vld [vmem:[#allocation7 + $0x38] sm:$0xff]  ;;  %v323_v19 = vld [vmem:[#allocation7 + $0x20] sm:$0xff]  ;;  %v516_v39 = vld [vmem:[#allocation7 + $0x50] sm:$0xff] }
  0x43   :  { %2202 = vmatpush3.msra.mxu0 %v116_v3  ;;  %v2726_v23 = vld [vmem:[#allocation8] sm:$0x7]  ;;  %v517_v38 = vld [vmem:[#allocation7 + $0x58] sm:$0xff]  ;;  %v2749_v54 = vld [vmem:[%s2949_s2 + $0x8] sm:$0xff]  ;;  %p2585_p0 = por %p2584_p13, %p2583_p12 }
  0x44   :  { %2203 = vmatprep.subr.mxu0 %v115_v4  ;;  %v220_v24 = vrot.slane %v2726_v23, %v2724_v22  ;;  %v2737_v37 = vld [vmem:[%s2949_s2] sm:$0xff]  ;;  %v330_v43 = vrot.slane %v2726_v23, %v2742_v40  ;;  %v620_v55 = vld [vmem:[#allocation7 + $0x78] sm:$0xff]  ;;  %v619_v56 = vld [vmem:[#allocation7 + $0x70] sm:$0xff] }
  0x45   :  { %2204 = vmatpush3.msra.mxu0 %v115_v4  ;;  %v618_v57 = vld [vmem:[#allocation7 + $0x68] sm:$0xff]  ;;  %v617_v58 = vld [vmem:[#allocation7 + $0x60] sm:$0xff]  ;;  %v803_v3 = vld [vmem:[#allocation7 + $0x98] sm:$0xff]  ;;  %p2586_p1 = pnand %p2585_p0, %p2579_p11 }
  0x46   :  { %2206 = vmatmul.mubr.msk.f32.vlgmr.msra.gmra.mxu0 %vm119_vm0, %v111_v5  ;;  %2225 = vmatprep.subr.mxu0 %v326_v16  ;;  %v515_v59 = vld [vmem:[#allocation7 + $0x48] sm:$0xff]  ;;  %v514_v60 = vld [vmem:[#allocation7 + $0x40] sm:$0xff]  ;;  %v802_v4 = vld [vmem:[#allocation7 + $0x90] sm:$0xff] }
  0x47   :  { %2208 = vmatprep.mubr.msk.f32.mxu0 %vm119_vm0, %v112_v6  ;;  %2226 = vmatpush3.msra.mxu0 %v326_v16  ;;  %v801_v5 = vld [vmem:[#allocation7 + $0x88] sm:$0xff]  ;;  %v800_v6 = vld [vmem:[#allocation7 + $0x80] sm:$0xff] }
  0x48   :  { %2227 = vmatprep.subr.mxu0 %v325_v17  ;;  %v2774_v20 = vld [vmem:[#allocation8 + $0x4] sm:$0x7] }
  0x49   :  { %2228 = vmatpush3.msra.mxu0 %v325_v17 }
  0x4a   :  { %2209 = vmatmul.mubr.msk.f32.gmra.mxu0 %vm119_vm0, %v113_v7  ;;  %2229 = vmatprep.subr.mxu0 %v324_v18  ;;  %v2770_v7 = vsub.s32 2, %v2721_v21 }
  0x4b   :  { %2230 = vmatpush3.msra.mxu0 %v324_v18 }
  0x4c   :  { %2231 = vmatprep.subr.mxu0 %v323_v19 }
  0x4d   :  { %2232 = vmatpush3.msra.mxu0 %v323_v19 }
  0x4e   :  { %2250 = vmatprep.subr.mxu0 %v517_v38 }
 0x106   :  { %v2207_v9 = vpop.f32.mrf.mxu0 }
 0x108   :  { %v198_v10 = vpop.f32.mrf.mxu0 }
 0x10a   :  { %v2210_v11 = vpop.f32.mrf.mxu0 }
 0x10b   :  { %2211 = vmatprep.subr.mxu1 %v2210_v11 }
 0x10c   :  { %v208_v12 = vpop.f32.mrf.mxu0  ;;  %2212 = vmatpush3.msra.mxu1 %v2210_v11 }
 0x10d   :  { %2213 = vmatprep.subr.mxu1 %v208_v12 }
 0x10e   :  { %2214 = vmatpush3.msra.mxu1 %v208_v12 }
 0x10f   :  { %2215 = vmatprep.subr.mxu1 %v2207_v9 }
 0x110   :  { %2216 = vmatpush3.msra.mxu1 %v2207_v9  ;;  %v521_v9 = vrot.slane %v2726_v23, %v2770_v7 }
 0x111   :  { %2217 = vmatprep.subr.mxu1 %v198_v10 }
 0x112   :  { %2218 = vmatpush3.msra.mxu1 %v198_v10 }
 0x113   :  { %2220 = vmatmul.mubr.msk.f32.vlgmr.msra.gmra.mxu1 %vm119_vm0, %v2709_v13 }
 0x114   :  { %2222 = vmatprep.mubr.msk.f32.mxu1 %vm119_vm0, %v2711_v14 }
 0x117   :  { %2223 = vmatmul.mubr.msk.f32.gmra.mxu1 %vm119_vm0, %v2717_v15 }
 0x118   :  { %2247 = vmatprep.mubr.msk.f32.mxu1 %vm119_vm0, %v2737_v37 }
 0x1d3   :  { %v2221_v25 = vpop.f32.mrf.mxu1 }
 0x1d4   :  { %v305_v26 = vadd.f32 %v2221_v25, %v220_v24 }
 0x1d5   :  { %v299_v27 = vpop.f32.mrf.mxu1 }
 0x1d6   :  { %v300_v28 = vadd.f32 %v299_v27, %v220_v24  ;;  %v319_v31 = vmax.f32 %v305_v26, 0.0 }
 0x1d7   :  { %v2224_v29 = vpop.f32.mrf.mxu1 }
 0x1d8   :  { %v318_v30 = vmax.f32 %v300_v28, 0.0  ;;  %v315_v32 = vadd.f32 %v2224_v29, %v220_v24 }
 0x1d9   :  { %v309_v33 = vpop.f32.mrf.mxu1 }
 0x1da   :  { %v310_v34 = vadd.f32 %v309_v33, %v220_v24  ;;  %2233 = vmatprep.mubr.msk.f32.mxu0 %vm119_vm0, %v318_v30  ;;  %v321_v36 = vmax.f32 %v315_v32, 0.0  ;;  %v709_v24 = vrot.slane %v2774_v20, %v2724_v22 }
 0x1db   :  { %2234 = vmatmul.mubr.msk.f32.vlgmr.msra.gmra.mxu0 %vm119_vm0, %v319_v31 }
 0x1dc   :  { %v320_v35 = vmax.f32 %v310_v34, 0.0  ;;  %2251 = vmatpush3.msra.mxu0 %v517_v38  ;;  %v986_v38 = vld [vmem:[#allocation7 + $0xa8] sm:$0xff] }
 0x1dd   :  { %2252 = vmatprep.subr.mxu0 %v516_v39 }
 0x1de   :  { %2236 = vmatprep.mubr.msk.f32.mxu0 %vm119_vm0, %v320_v35  ;;  %2253 = vmatpush3.msra.mxu0 %v516_v39 }
 0x1df   :  { %2237 = vmatmul.mubr.msk.f32.gmra.mxu0 %vm119_vm0, %v321_v36  ;;  %2254 = vmatprep.subr.mxu0 %v515_v59 }
 0x1e0   :  { %2255 = vmatpush3.msra.mxu0 %v515_v59 }
 0x1e1   :  { %2256 = vmatprep.subr.mxu0 %v514_v60 }
 0x1e2   :  { %2257 = vmatpush3.msra.mxu0 %v514_v60 }
 0x29b   :  { %v2235_v41 = vpop.f32.mrf.mxu0 }
 0x29c   :  { %v415_v47 = vadd.f32 %v2235_v41, %v330_v43 }
 0x29d   :  { %v409_v42 = vpop.f32.mrf.mxu0 }
 0x29e   :  { %v410_v50 = vadd.f32 %v409_v42, %v330_v43  ;;  %v429_v52 = vmax.f32 %v415_v47, 0.0  ;;  %v807_v42 = vrot.slane %v2774_v20, %v2742_v40 }
 0x29f   :  { %v2238_v44 = vpop.f32.mrf.mxu0 }
 0x2a0   :  { %v425_v45 = vadd.f32 %v2238_v44, %v330_v43  ;;  %v428_v53 = vmax.f32 %v410_v50, 0.0 }
 0x2a1   :  { %v419_v46 = vpop.f32.mrf.mxu0 }
 0x2a2   :  { %v431_v48 = vmax.f32 %v425_v45, 0.0  ;;  %v420_v49 = vadd.f32 %v419_v46, %v330_v43 }
 0x2a4   :  { %v430_v51 = vmax.f32 %v420_v49, 0.0  ;;  %2239 = vmatprep.subr.mxu1 %v431_v48 }
 0x2a5   :  { %2240 = vmatpush3.msra.mxu1 %v431_v48 }
 0x2a6   :  { %2241 = vmatprep.subr.mxu1 %v430_v51 }
 0x2a7   :  { %2242 = vmatpush3.msra.mxu1 %v430_v51 }
 0x2a8   :  { %2243 = vmatprep.subr.mxu1 %v429_v52 }
 0x2a9   :  { %2244 = vmatpush3.msra.mxu1 %v429_v52 }
 0x2aa   :  { %2245 = vmatprep.subr.mxu1 %v428_v53 }
 0x2ab   :  { %2246 = vmatpush3.msra.mxu1 %v428_v53  ;;  %v985_v53 = vld [vmem:[#allocation7 + $0xa0] sm:$0xff] }
 0x2ac   :  { %2248 = vmatmul.mubr.msk.f32.vlgmr.msra.gmra.mxu1 %vm119_vm0, %v2749_v54  ;;  %2261 = vmatprep.subr.mxu1 %v620_v55 }
 0x2ad   :  { %2262 = vmatpush3.msra.mxu1 %v620_v55  ;;  %2269 = vmatprep.mubr.msk.f32.mxu1 %vm119_vm0, %v318_v30  ;;  %v2615_v55 = vmov 0.0  }
 0x2ae   :  { %2263 = vmatprep.subr.mxu1 %v619_v56 }
 0x2af   :  { %2264 = vmatpush3.msra.mxu1 %v619_v56 }
 0x2b0   :  { %2265 = vmatprep.subr.mxu1 %v618_v57 }
 0x2b1   :  { %2266 = vmatpush3.msra.mxu1 %v618_v57 }
 0x2b2   :  { %2267 = vmatprep.subr.mxu1 %v617_v58 }
 0x2b3   :  { %2268 = vmatpush3.msra.mxu1 %v617_v58 }
 0x2b4   :  { %2270 = vmatmul.mubr.msk.f32.vlgmr.msra.gmra.mxu1 %vm119_vm0, %v319_v31  ;;  %2289 = vmatprep.subr.mxu1 %v803_v3 }
 0x2b5   :  { %2272 = vmatprep.mubr.msk.f32.mxu1 %vm119_vm0, %v320_v35  ;;  %2290 = vmatpush3.msra.mxu1 %v803_v3  ;;  %v988_v35 = vld [vmem:[#allocation7 + $0xb8] sm:$0xff] }
 0x2b6   :  { %2291 = vmatprep.subr.mxu1 %v802_v4  ;;  %v1084_v3 = vld [vmem:[#allocation10 + $0x30] sm:$0xff] }
 0x2b7   :  { %2292 = vmatpush3.msra.mxu1 %v802_v4  ;;  %v1083_v4 = vld [vmem:[#allocation10 + $0x28] sm:$0xff] }
 0x2b8   :  { %2273 = vmatmul.mubr.msk.f32.gmra.mxu1 %vm119_vm0, %v321_v36  ;;  %2293 = vmatprep.subr.mxu1 %v801_v5  ;;  %v987_v36 = vld [vmem:[#allocation7 + $0xb0] sm:$0xff] }
 0x2b9   :  { %2294 = vmatpush3.msra.mxu1 %v801_v5  ;;  %v1082_v5 = vld [vmem:[#allocation10 + $0x20] sm:$0xff] }
 0x2ba   :  { %2295 = vmatprep.subr.mxu1 %v800_v6 }
 0x2bb   :  { %2296 = vmatpush3.msra.mxu1 %v800_v6  ;;  %v1238_v6 = vld [vmem:[#allocation7 + $0xd8] sm:$0xff] }
 0x2bc   :  { %2314 = vmatprep.subr.mxu1 %v988_v35 }
 0x36c   :  { %v2249_v61 = vpop.f32.mrf.mxu1 }
 0x36e   :  { %v504_v62 = vpop.f32.mrf.mxu1 }
 0x36f   :  { %2258 = vmatprep.mubr.msk.f32.mxu0 %vm119_vm0, %v504_v62  ;;  %v612_v62 = vld [vmem:[#allocation10 + $0x10] sm:$0xff] }
 0x370   :  { %2259 = vmatmul.mubr.msk.f32.vlgmr.msra.gmra.mxu0 %vm119_vm0, %v2249_v61  ;;  %v613_v61 = vld [vmem:[#allocation10 + $0x18] sm:$0xff] }
 0x371   :  { %2283 = vmatprep.mubr.msk.f32.mxu0 %vm119_vm0, %v2705_v8 }
 0x374   :  { %v2271_v63 = vpop.f32.mrf.mxu1 }
 0x376   :  { %v687_v0 = vpop.f32.mrf.mxu1 }
 0x378   :  { %v2274_v1 = vpop.f32.mrf.mxu1 }
 0x379   :  { %2275 = vmatprep.subr.mxu0 %v2274_v1 }
 0x37a   :  { %v697_v2 = vpop.f32.mrf.mxu1  ;;  %2276 = vmatpush3.msra.mxu0 %v2274_v1 }
 0x37b   :  { %2277 = vmatprep.subr.mxu0 %v697_v2 }
 0x37c   :  { %2278 = vmatpush3.msra.mxu0 %v697_v2  ;;  %v1085_v2 = vld [vmem:[#allocation10 + $0x38] sm:$0xff] }
 0x37d   :  { %2279 = vmatprep.subr.mxu0 %v2271_v63 }
 0x37e   :  { %2280 = vmatpush3.msra.mxu0 %v2271_v63  ;;  %v611_v63 = vld [vmem:[#allocation10 + $0x8] sm:$0xff] }
 0x37f   :  { %2281 = vmatprep.subr.mxu0 %v687_v0 }
 0x380   :  { %2282 = vmatpush3.msra.mxu0 %v687_v0  ;;  %v610_v0 = vld [vmem:[#allocation10] sm:$0xff] }
 0x381   :  { %2284 = vmatmul.mubr.msk.f32.vlgmr.msra.gmra.mxu0 %vm119_vm0, %v2709_v13 }
 0x382   :  { %2286 = vmatprep.mubr.msk.f32.mxu0 %vm119_vm0, %v2711_v14 }
 0x385   :  { %2287 = vmatmul.mubr.msk.f32.gmra.mxu0 %vm119_vm0, %v2717_v15 }
 0x386   :  { %2311 = vmatprep.mubr.msk.f32.mxu0 %vm119_vm0, %v2737_v37 }
 0x430   :  { %v2260_v10 = vpop.f32.mrf.mxu0 }
 0x431   :  { %v600_v11 = vadd.f32 %v2260_v10, %v521_v9 }
 0x432   :  { %v594_v12 = vpop.f32.mrf.mxu0 }
 0x433   :  { %v595_v16 = vadd.f32 %v594_v12, %v521_v9  ;;  %v604_v17 = vmax.f32 %v600_v11, 0.0  ;;  %v992_v9 = vrot.slane %v2774_v20, %v2770_v7  ;;  %v1236_v20 = vld [vmem:[#allocation7 + $0xc8] sm:$0xff] }
 0x435   :  { %v603_v18 = vmax.f32 %v595_v16, 0.0 }
 0x437   :  { %v605_v19 = vsub.f32 %v603_v18, %v604_v17 }
 0x439   :  { %v606_v56 = vmul.f32 %v605_v19, %v605_v19 }
 0x43b   :  { %v607_v57 = vsub.f32 0.0, %v606_v56 }
 0x43d   :  { %v608_v58 = vmul.f32 1.442695, %v607_v57 }
 0x43f   :  { %2466 = vpow2.f32 %v608_v58 }
 0x441   :  { %v2285_v25 = vpop.f32.mrf.mxu0 }
 0x442   :  { %v2778_v26 = vadd.f32 %v2285_v25, %v709_v24 }
 0x443   :  { %v776_v21 = vpop.f32.mrf.mxu0 }
 0x444   :  { %v2780_v27 = vadd.f32 %v776_v21, %v709_v24  ;;  %v796_v29 = vmax.f32 %v2778_v26, 0.0  ;;  %v1421_v26 = vld [vmem:[#allocation7 + $0xf8] sm:$0xff] }
 0x445   :  { %v2288_v28 = vpop.f32.mrf.mxu0 }
 0x446   :  { %v795_v23 = vmax.f32 %v2780_v27, 0.0  ;;  %v2784_v30 = vadd.f32 %v2288_v28, %v709_v24 }
 0x447   :  { %v786_v31 = vpop.f32.mrf.mxu0 }
 0x448   :  { %v2786_v32 = vadd.f32 %v786_v31, %v709_v24  ;;  %2297 = vmatprep.mubr.msk.f32.mxu1 %vm119_vm0, %v795_v23  ;;  %v798_v34 = vmax.f32 %v2784_v30, 0.0  ;;  %v1419_v30 = vld [vmem:[#allocation7 + $0xe8] sm:$0xff] }
 0x449   :  { %2298 = vmatmul.mubr.msk.f32.vlgmr.msra.gmra.mxu1 %vm119_vm0, %v796_v29 }
 0x44a   :  { %v797_v33 = vmax.f32 %v2786_v32, 0.0  ;;  %2315 = vmatpush3.msra.mxu1 %v988_v35  ;;  %v1237_v35 = vld [vmem:[#allocation7 + $0xd0] sm:$0xff]  ;;  %v1418_v32 = vld [vmem:[#allocation7 + $0xe0] sm:$0xff] }
 0x44b   :  { %2316 = vmatprep.subr.mxu1 %v987_v36 }
 0x44c   :  { %2300 = vmatprep.mubr.msk.f32.mxu1 %vm119_vm0, %v797_v33  ;;  %2317 = vmatpush3.msra.mxu1 %v987_v36  ;;  %v2467_v1 = vpop.eup %2466  ;;  %v1235_v36 = vld [vmem:[#allocation7 + $0xc0] sm:$0xff] }
 0x44d   :  { %2301 = vmatmul.mubr.msk.f32.gmra.mxu1 %vm119_vm0, %v798_v34  ;;  %2318 = vmatprep.subr.mxu1 %v986_v38 }
 0x44e   :  { %2319 = vmatpush3.msra.mxu1 %v986_v38 }
 0x44f   :  { %2320 = vmatprep.subr.mxu1 %v985_v53 }
 0x450   :  { %2321 = vmatpush3.msra.mxu1 %v985_v53 }
 0x451   :  { %2336 = vmatprep.subr.mxu1 %v2615_v55 }
 0x509   :  { %v2299_v39 = vpop.f32.mrf.mxu1 }
 0x50a   :  { %v892_v46 = vadd.f32 %v2299_v39, %v807_v42 }
 0x50b   :  { %v886_v41 = vpop.f32.mrf.mxu1 }
 0x50c   :  { %v887_v49 = vadd.f32 %v886_v41, %v807_v42  ;;  %v906_v51 = vmax.f32 %v892_v46, 0.0 }
 0x50d   :  { %v2302_v43 = vpop.f32.mrf.mxu1 }
 0x50e   :  { %v902_v44 = vadd.f32 %v2302_v43, %v807_v42  ;;  %v905_v52 = vmax.f32 %v887_v49, 0.0 }
 0x50f   :  { %v896_v45 = vpop.f32.mrf.mxu1 }
 0x510   :  { %v908_v47 = vmax.f32 %v902_v44, 0.0  ;;  %v897_v48 = vadd.f32 %v896_v45, %v807_v42 }
 0x512   :  { %v907_v50 = vmax.f32 %v897_v48, 0.0  ;;  %2303 = vmatprep.subr.mxu0 %v908_v47 }
 0x513   :  { %2304 = vmatpush3.msra.mxu0 %v908_v47 }
 0x514   :  { %2305 = vmatprep.subr.mxu0 %v907_v50 }
 0x515   :  { %2306 = vmatpush3.msra.mxu0 %v907_v50 }
 0x516   :  { %2307 = vmatprep.subr.mxu0 %v906_v51 }
 0x517   :  { %2308 = vmatpush3.msra.mxu0 %v906_v51  ;;  %v1605_v51 = vld [vmem:[#allocation7 + $0x110] sm:$0xff] }
 0x518   :  { %2309 = vmatprep.subr.mxu0 %v905_v52 }
 0x519   :  { %2310 = vmatpush3.msra.mxu0 %v905_v52 }
 0x51a   :  { %2312 = vmatmul.mubr.msk.f32.vlgmr.msra.gmra.mxu0 %vm119_vm0, %v2749_v54  ;;  %2325 = vmatprep.subr.mxu0 %v2615_v55 }
 0x51b   :  { %2333 = vmatprep.mubr.msk.f32.mxu0 %vm2616_vm1, %v2615_v55  ;;  %2326 = vmatpush3.msra.mxu0 %v1085_v2 }
 0x51c   :  { %2327 = vmatprep.subr.mxu0 %v2615_v55 }
 0x51d   :  { %2328 = vmatpush3.msra.mxu0 %v1084_v3  ;;  %v1603_v3 = vld [vmem:[#allocation7 + $0x100] sm:$0xff] }
 0x51e   :  { %2329 = vmatprep.subr.mxu0 %v2615_v55 }
 0x51f   :  { %2330 = vmatpush3.msra.mxu0 %v1083_v4 }
 0x520   :  { %2331 = vmatprep.subr.mxu0 %v2615_v55 }
 0x521   :  { %2332 = vmatpush3.msra.mxu0 %v1082_v5 }
 0x522   :  { %2347 = vmatprep.subr.mxu0 %v1238_v6 }
 0x5da   :  { %v2313_v59 = vpop.f32.mrf.mxu0 }
 0x5dc   :  { %v975_v60 = vpop.f32.mrf.mxu0 }
 0x5dd   :  { %2322 = vmatprep.mubr.msk.f32.mxu1 %vm119_vm0, %v975_v60 }
 0x5de   :  { %2323 = vmatmul.mubr.msk.f32.vlgmr.msra.gmra.mxu1 %vm119_vm0, %v2313_v59 }
 0x5df   :  { %2337 = vmatpush3.msra.mxu1 %v613_v61  ;;  %2344 = vmatprep.mubr.msk.f32.mxu1 %vm2616_vm1, %v2615_v55 }
 0x5e0   :  { %2338 = vmatprep.subr.mxu1 %v2615_v55 }
 0x5e1   :  { %2339 = vmatpush3.msra.mxu1 %v612_v62 }
 0x5e2   :  { %2340 = vmatprep.subr.mxu1 %v2615_v55 }
 0x5e3   :  { %2341 = vmatpush3.msra.mxu1 %v611_v63 }
 0x5e4   :  { %2342 = vmatprep.subr.mxu1 %v2615_v55 }
 0x5e5   :  { %2343 = vmatpush3.msra.mxu1 %v610_v0 }
 0x5e6   :  { %2345 = vmatmul.mubr.msk.f32.vlgmr.msra.gmra.mxu1 %vm119_vm0, %v2467_v1 }
 0x5e7   :  { %2369 = vmatprep.mubr.msk.f32.mxu1 %vm119_vm0, %v2705_v8 }
 0x69e   :  { %v2324_v8 = vpop.f32.mrf.mxu1 }
 0x69f   :  { %v1071_v10 = vadd.f32 %v2324_v8, %v992_v9  ;;  %v1700_v8 = vld [vmem:[#allocation10 + $0x40] sm:$0xff] }
 0x6a0   :  { %v1065_v11 = vpop.f32.mrf.mxu1 }
 0x6a1   :  { %v1066_v12 = vadd.f32 %v1065_v11, %v992_v9  ;;  %v1075_v16 = vmax.f32 %v1071_v10, 0.0  ;;  %v1701_v9 = vld [vmem:[#allocation10 + $0x48] sm:$0xff]  ;;  %v1790_v10 = vld [vmem:[%s2953_s6 + $0x28] sm:$0xff]  ;;  %v1789_v11 = vld [vmem:[%s2953_s6 + $0x20] sm:$0xff] }
 0x6a3   :  { %v1074_v17 = vmax.f32 %v1066_v12, 0.0 }
 0x6a5   :  { %v1076_v18 = vsub.f32 %v1074_v17, %v1075_v16 }
 0x6a6   :  { %v2825_v19 = vpop.f32.mrf.mxu1 }
 0x6a7   :  { %v1077_v24 = vmul.f32 %v1076_v18, %v1076_v18 }
 0x6a8   :  { %v2346_v25 = vpop.f32.mrf.mxu1 }
 0x6a9   :  { %v1078_v21 = vsub.f32 0.0, %v1077_v24 }
 0x6ab   :  { %v1079_v28 = vmul.f32 1.442695, %v1078_v21 }
 0x6ad   :  { %2468 = vpow2.f32 %v1079_v28 }
 0x6ba   :  { %v2469_v31 = vpop.eup %2468 }
 0x6bb   :  { %2334 = vmatmul.mubr.msk.f32.vlgmr.msra.gmra.mxu0 %vm119_vm0, %v2469_v31 }
 0x6bc   :  { %2348 = vmatpush3.msra.mxu0 %v1238_v6  ;;  %2355 = vmatprep.mubr.msk.f32.mxu0 %vm119_vm0, %v795_v23  ;;  %v1702_v6 = vld [vmem:[#allocation10 + $0x50] sm:$0xff] }
 0x6bd   :  { %2349 = vmatprep.subr.mxu0 %v1237_v35 }
 0x6be   :  { %2350 = vmatpush3.msra.mxu0 %v1237_v35 }
 0x6bf   :  { %2351 = vmatprep.subr.mxu0 %v1236_v20 }
 0x6c0   :  { %2352 = vmatpush3.msra.mxu0 %v1236_v20 }
 0x6c1   :  { %2353 = vmatprep.subr.mxu0 %v1235_v36 }
 0x6c2   :  { %2354 = vmatpush3.msra.mxu0 %v1235_v36 }
 0x6c3   :  { %2356 = vmatmul.mubr.msk.f32.vlgmr.msra.gmra.mxu0 %vm119_vm0, %v796_v29  ;;  %2375 = vmatprep.subr.mxu0 %v1421_v26  ;;  %v1420_v29 = vld [vmem:[#allocation7 + $0xf0] sm:$0xff] }
 0x6c4   :  { %2358 = vmatprep.mubr.msk.f32.mxu0 %vm119_vm0, %v797_v33  ;;  %2376 = vmatpush3.msra.mxu0 %v1421_v26  ;;  %v2052_v26 = vld [vmem:[%s2954_s7] ss:$0 sm:$0xff] }
 0x6c5   :  { %2377 = vmatprep.subr.mxu0 %v1420_v29 }
 0x6c6   :  { %2378 = vmatpush3.msra.mxu0 %v1420_v29 }
 0x6c7   :  { %2359 = vmatmul.mubr.msk.f32.gmra.mxu0 %vm119_vm0, %v798_v34  ;;  %2379 = vmatprep.subr.mxu0 %v1419_v30 }
 0x6c8   :  { %2380 = vmatpush3.msra.mxu0 %v1419_v30 }
 0x6c9   :  { %2381 = vmatprep.subr.mxu0 %v1418_v32 }
 0x6ca   :  { %2382 = vmatpush3.msra.mxu0 %v1418_v32 }
 0x77b   :  { %v2840_v27 = vpop.f32.mrf.mxu0 }
 0x77d   :  { %v2335_v23 = vpop.f32.mrf.mxu0 }
 0x77e   :  { %v1787_v23 = vld [vmem:[%s2953_s6 + $0x10] sm:$0xff] }
 0x783   :  { %v2357_v38 = vpop.f32.mrf.mxu0 }
 0x785   :  { %v1305_v39 = vpop.f32.mrf.mxu0 }
 0x787   :  { %v2360_v41 = vpop.f32.mrf.mxu0 }
 0x788   :  { %2361 = vmatprep.subr.mxu1 %v2360_v41 }
 0x789   :  { %v1315_v42 = vpop.f32.mrf.mxu0  ;;  %2362 = vmatpush3.msra.mxu1 %v2360_v41  ;;  %v1229_v41 = vadd.f32 %v2825_v19, %v2840_v27  ;;  %v1875_v19 = vld [vmem:[%s2955_s8 + $0x20] sm:$0xff]  ;;  %v1874_v27 = vld [vmem:[%s2955_s8 + $0x18] sm:$0xff] }
 0x78a   :  { %2363 = vmatprep.subr.mxu1 %v1315_v42 }
 0x78b   :  { %2364 = vmatpush3.msra.mxu1 %v1315_v42 }
 0x78c   :  { %2365 = vmatprep.subr.mxu1 %v2357_v38 }
 0x78d   :  { %2366 = vmatpush3.msra.mxu1 %v2357_v38  ;;  %v1786_v38 = vld [vmem:[%s2953_s6 + $0x8] sm:$0xff] }
 0x78e   :  { %2367 = vmatprep.subr.mxu1 %v1305_v39 }
 0x78f   :  { %2368 = vmatpush3.msra.mxu1 %v1305_v39  ;;  %v1785_v39 = vld [vmem:[%s2953_s6] sm:$0xff] }
 0x790   :  { %2370 = vmatmul.mubr.msk.f32.vlgmr.msra.gmra.mxu1 %vm119_vm0, %v2709_v13  ;;  %v2850_v13 = vld [vmem:[#allocation8 + $0x8] sm:$0x7] }
 0x791   :  { %2372 = vmatprep.mubr.msk.f32.mxu1 %vm119_vm0, %v2711_v14  ;;  %v1327_v14 = vrot.slane %v2850_v13, %v2724_v22  ;;  %v1606_v22 = vld [vmem:[#allocation7 + $0x118] sm:$0xff]  ;;  %v1425_v56 = vrot.slane %v2850_v13, %v2742_v40  ;;  %v1604_v40 = vld [vmem:[#allocation7 + $0x108] sm:$0xff]  ;;  %v1610_v12 = vrot.slane %v2850_v13, %v2770_v7 }
 0x792   :  { %2400 = vmatprep.subr.mxu0 %v1606_v22  ;;  %v1788_v7 = vld [vmem:[%s2953_s6 + $0x18] sm:$0xff] }
 0x794   :  { %2373 = vmatmul.mubr.msk.f32.gmra.mxu1 %vm119_vm0, %v2717_v15 }
 0x795   :  { %2397 = vmatprep.mubr.msk.f32.mxu1 %vm119_vm0, %v2737_v37 }
 0x850   :  { %v2371_v15 = vpop.f32.mrf.mxu1 }
 0x851   :  { %v1400_v33 = vadd.f32 %v2371_v15, %v1327_v14  ;;  %v1873_v15 = vld [vmem:[%s2955_s8 + $0x10] sm:$0xff] }
 0x852   :  { %v1394_v37 = vpop.f32.mrf.mxu1 }
 0x853   :  { %v1395_v34 = vadd.f32 %v1394_v37, %v1327_v14  ;;  %v1414_v45 = vmax.f32 %v1400_v33, 0.0  ;;  %v1872_v33 = vld [vmem:[%s2955_s8 + $0x8] sm:$0xff]  ;;  %v1871_v37 = vld [vmem:[%s2955_s8] sm:$0xff] }
 0x854   :  { %v2374_v43 = vpop.f32.mrf.mxu1 }
 0x855   :  { %v1413_v44 = vmax.f32 %v1395_v34, 0.0  ;;  %v1410_v46 = vadd.f32 %v2374_v43, %v1327_v14  ;;  %v2053_v34 = vld [vmem:[%s2954_s7 + $0x1] ss:$0 sm:$0xff] }
 0x856   :  { %v1404_v47 = vpop.f32.mrf.mxu1 }
 0x857   :  { %v1405_v48 = vadd.f32 %v1404_v47, %v1327_v14  ;;  %2383 = vmatprep.mubr.msk.f32.mxu0 %vm119_vm0, %v1413_v44  ;;  %v1416_v50 = vmax.f32 %v1410_v46, 0.0  ;;  %v1876_v14 = vld [vmem:[%s2955_s8 + $0x28] sm:$0xff]  ;;  %v2055_v47 = vld [vmem:[%s2956_s9] ss:$0 sm:$0xff] }
 0x858   :  { %2384 = vmatmul.mubr.msk.f32.vlgmr.msra.gmra.mxu0 %vm119_vm0, %v1414_v45 }
 0x859   :  { %v1415_v49 = vmax.f32 %v1405_v48, 0.0  ;;  %2401 = vmatpush3.msra.mxu0 %v1606_v22 }
 0x85a   :  { %2402 = vmatprep.subr.mxu0 %v1605_v51 }
 0x85b   :  { %2386 = vmatprep.mubr.msk.f32.mxu0 %vm119_vm0, %v1415_v49  ;;  %2403 = vmatpush3.msra.mxu0 %v1605_v51 }
 0x85c   :  { %2387 = vmatmul.mubr.msk.f32.gmra.mxu0 %vm119_vm0, %v1416_v50  ;;  %2404 = vmatprep.subr.mxu0 %v1604_v40 }
 0x85d   :  { %2405 = vmatpush3.msra.mxu0 %v1604_v40 }
 0x85e   :  { %2406 = vmatprep.subr.mxu0 %v1603_v3 }
 0x85f   :  { %2407 = vmatpush3.msra.mxu0 %v1603_v3 }
 0x860   :  { %2422 = vmatprep.subr.mxu0 %v2615_v55 }
 0x918   :  { %v2385_v52 = vpop.f32.mrf.mxu0 }
 0x919   :  { %v1510_v60 = vadd.f32 %v2385_v52, %v1425_v56 }
 0x91a   :  { %v1504_v53 = vpop.f32.mrf.mxu0 }
 0x91b   :  { %v1505_v63 = vadd.f32 %v1504_v53, %v1425_v56  ;;  %v1524_v1 = vmax.f32 %v1510_v60, 0.0  ;;  %v2617_v53 = vmov 0  }
 0x91c   :  { %v2388_v57 = vpop.f32.mrf.mxu0  ;;  %2465 = vset.pattern.permute.xlu0 %v2617_v53 }
 0x91d   :  { %v1520_v58 = vadd.f32 %v2388_v57, %v1425_v56  ;;  %v1523_v2 = vmax.f32 %v1505_v63, 0.0 }
 0x91e   :  { %v1514_v59 = vpop.f32.mrf.mxu0 }
 0x91f   :  { %v1526_v61 = vmax.f32 %v1520_v58, 0.0  ;;  %v1515_v62 = vadd.f32 %v1514_v59, %v1425_v56  ;;  %v2058_v56 = vld [vmem:[%s2956_s9 + $0x2] ss:$0 sm:$0xff] }
 0x921   :  { %v1525_v0 = vmax.f32 %v1515_v62, 0.0  ;;  %2389 = vmatprep.subr.mxu1 %v1526_v61 }
 0x922   :  { %2390 = vmatpush3.msra.mxu1 %v1526_v61 }
 0x923   :  { %2391 = vmatprep.subr.mxu1 %v1525_v0 }
 0x924   :  { %2392 = vmatpush3.msra.mxu1 %v1525_v0 }
 0x925   :  { %2393 = vmatprep.subr.mxu1 %v1524_v1 }
 0x926   :  { %2394 = vmatpush3.msra.mxu1 %v1524_v1 }
 0x927   :  { %2395 = vmatprep.subr.mxu1 %v1523_v2 }
 0x928   :  { %2396 = vmatpush3.msra.mxu1 %v1523_v2 }
 0x929   :  { %2398 = vmatmul.mubr.msk.f32.vlgmr.msra.gmra.mxu1 %vm119_vm0, %v2749_v54  ;;  %2411 = vmatprep.subr.mxu1 %v2615_v55  ;;  %v1703_v54 = vld [vmem:[#allocation10 + $0x58] sm:$0xff] }
 0x92a   :  { %2419 = vmatprep.mubr.msk.f32.mxu1 %vm2616_vm1, %v2615_v55  ;;  %2412 = vmatpush3.msra.mxu1 %v1703_v54 }
 0x92b   :  { %2413 = vmatprep.subr.mxu1 %v2615_v55 }
 0x92c   :  { %2414 = vmatpush3.msra.mxu1 %v1702_v6 }
 0x92d   :  { %2415 = vmatprep.subr.mxu1 %v2615_v55 }
 0x92e   :  { %2416 = vmatpush3.msra.mxu1 %v1701_v9 }
 0x92f   :  { %2417 = vmatprep.subr.mxu1 %v2615_v55 }
 0x930   :  { %2418 = vmatpush3.msra.mxu1 %v1700_v8 }
 0x931   :  { %2437 = vmatprep.subr.mxu1 %v2615_v55 }
 0x9e9   :  { %v2399_v4 = vpop.f32.mrf.mxu1 }
 0x9eb   :  { %v1593_v5 = vpop.f32.mrf.mxu1 }
 0x9ec   :  { %2408 = vmatprep.mubr.msk.f32.mxu0 %vm119_vm0, %v1593_v5 }
 0x9ed   :  { %2409 = vmatmul.mubr.msk.f32.vlgmr.msra.gmra.mxu0 %vm119_vm0, %v2399_v4 }
 0x9ee   :  { %2434 = vmatprep.mubr.msk.f32.mxu0 %vm2616_vm1, %v2615_v55  ;;  %2423 = vmatpush3.msra.mxu0 %v1790_v10 }
 0x9ef   :  { %2424 = vmatprep.subr.mxu0 %v2615_v55 }
 0x9f0   :  { %2425 = vmatpush3.msra.mxu0 %v1789_v11 }
 0x9f1   :  { %2426 = vmatprep.subr.mxu0 %v2615_v55 }
 0x9f2   :  { %2427 = vmatpush3.msra.mxu0 %v1788_v7 }
 0x9f3   :  { %2428 = vmatprep.subr.mxu0 %v2615_v55 }
 0x9f4   :  { %2429 = vmatpush3.msra.mxu0 %v1787_v23 }
 0x9f5   :  { %2430 = vmatprep.subr.mxu0 %v2615_v55 }
 0x9f6   :  { %2431 = vmatpush3.msra.mxu0 %v1786_v38 }
 0x9f7   :  { %2432 = vmatprep.subr.mxu0 %v2615_v55 }
 0x9f8   :  { %2433 = vmatpush3.msra.mxu0 %v1785_v39 }
 0xaad   :  { %v2410_v16 = vpop.f32.mrf.mxu0 }
 0xaae   :  { %v1689_v17 = vadd.f32 %v2410_v16, %v1610_v12 }
 0xaaf   :  { %v1683_v18 = vpop.f32.mrf.mxu0 }
 0xab0   :  { %v1684_v24 = vadd.f32 %v1683_v18, %v1610_v12  ;;  %v1693_v25 = vmax.f32 %v1689_v17, 0.0 }
 0xab2   :  { %v1692_v21 = vmax.f32 %v1684_v24, 0.0 }
 0xab4   :  { %v1694_v28 = vsub.f32 %v1692_v21, %v1693_v25 }
 0xab6   :  { %v1695_v31 = vmul.f32 %v1694_v28, %v1694_v28 }
 0xab8   :  { %v1696_v35 = vsub.f32 0.0, %v1695_v31 }
 0xaba   :  { %v1697_v20 = vmul.f32 1.442695, %v1696_v35 }
 0xabc   :  { %2470 = vpow2.f32 %v1697_v20 }
 0xac9   :  { %v2471_v36 = vpop.eup %2470 }
 0xaca   :  { %2420 = vmatmul.mubr.msk.f32.vlgmr.msra.gmra.mxu1 %vm119_vm0, %v2471_v36 }
 0xacb   :  { %2449 = vmatprep.mubr.msk.f32.mxu1 %vm2616_vm1, %v2615_v55  ;;  %2438 = vmatpush3.msra.mxu1 %v1876_v14 }
 0xacc   :  { %2439 = vmatprep.subr.mxu1 %v2615_v55 }
 0xacd   :  { %2440 = vmatpush3.msra.mxu1 %v1875_v19 }
 0xace   :  { %2441 = vmatprep.subr.mxu1 %v2615_v55 }
 0xacf   :  { %2442 = vmatpush3.msra.mxu1 %v1874_v27 }
 0xad0   :  { %2443 = vmatprep.subr.mxu1 %v2615_v55 }
 0xad1   :  { %2444 = vmatpush3.msra.mxu1 %v1873_v15 }
 0xad2   :  { %2445 = vmatprep.subr.mxu1 %v2615_v55 }
 0xad3   :  { %2446 = vmatpush3.msra.mxu1 %v1872_v33 }
 0xad4   :  { %2447 = vmatprep.subr.mxu1 %v2615_v55  ;;  %v2057_v55 = vld [vmem:[%s2956_s9 + $0x1] ss:$0 sm:$0xff] }
 0xad5   :  { %2448 = vmatpush3.msra.mxu1 %v1871_v37 }
 0xb8a   :  { %v1773_v42 = vpop.f32.mrf.mxu1 }
 0xb8b   :  { %v1777_v29 = vadd.f32 %v1773_v42, %v1229_v41 }
 0xb8c   :  { %v2421_v30 = vpop.f32.mrf.mxu1 }
 0xb8d   :  { %v1783_v32 = vadd.f32 %v2052_v26, %v1777_v29 }
 0xb8f   :  { %v1784_v13 = vmax.f32 %v1783_v32, 0.0 }
 0xb91   :  { %2435 = vmatmul.mubr.msk.f32.vlgmr.msra.gmra.mxu0 %vm1796_vm2, %v1784_v13 }
 0xc51   :  { %v1866_v43 = vpop.f32.mrf.mxu0 }
 0xc52   :  { %v1867_v44 = vadd.f32 %v2053_v34, %v1866_v43 }
 0xc53   :  { %v2436_v45 = vpop.f32.mrf.mxu0 }
 0xc54   :  { %2472 = vtanh.f32 %v1867_v44 }
 0xc61   :  { %v2473_v46 = vpop.eup %2472 }
 0xc62   :  { %2450 = vmatmul.mubr.msk.f32.vlgmr.msra.gmra.mxu1 %vm1796_vm2, %v2473_v46 }
 0xd22   :  { %v1951_v48 = vpop.f32.mrf.mxu1 }
 0xd23   :  { %v1952_v49 = vadd.f32 %v2055_v47, %v1951_v48 }
 0xd24   :  { %v2451_v50 = vpop.f32.mrf.mxu1 }
 0xd25   :  { %v1955_v22 = vmax.f32 %v1952_v49, 0.0 }
 0xd27   :  { %v1961_v51 = vmul.f32 %v2057_v55, %v1955_v22 }
 0xd29   :  { %v1963_v52 = vsel %vm1962_vm3, %v1961_v51, 0.0 }
 0xd2a   :  { %1964 = vadd.xlane.f32.xlu0 %v1963_v52 }
 0xdb3   :  { %v1965_v57 = vpop.xlane.xlu0 %1964 }
 0xdb4   :  { %v1971_v58 = vadd.f32 %v2058_v56, %v1965_v57 }
 0xdb6   :  { %v2059_v59 = vmul.f32 -1.442695, %v1971_v58 }
 0xdb8   :  { %2474 = vpow2.f32 %v2059_v59 }
 0xdc5   :  { %v2475_v60 = vpop.eup %2474 }
 0xdc6   :  { %v1975_v61 = vadd.f32 1.0, %v2475_v60 }
 0xdc8   :  { %2476 = vrcp.f32 %v1975_v61 }
 0xdd5   :  { %v2477_v62 = vpop.eup %2476 }
 0xdd6   :  { %1980 = vperm.xlu0 %2465, %v2477_v62  }
 0xe51   :  { %v1981_v63 = vpop.permute.xlu0 %1980 }
 0xe52   :  { %1983 = vst [vmem:[#allocation11] sm:$0xff] %v1981_v63 }
 0xe53   :  { %2589 = shalt.err (!%p2586_p1)
}
 0xe54   :  { %1993 = dma.vmem_to_hbm [thread:$0]  %s1991_s26, 128, %s2957_s10, [#allocation4]  }
 0xe55   :  { %2604 = dma.done.wait [#allocation4], 128  }
 0xe56   :  { %2605 = vsyncadd [#allocation4], 4294967168 }
 0xe57   :  { %1997 = vsyncpa [#allocation3], 1 }
 0xe58   :  { %1998 = vsyncpa [#allocation6], 1 }
 0xe59   :  { %1999 = vsyncpa [#allocation9], 1 }
 0xe5a   :  { %2000 = vsyncpa [#allocation4], 1 }

</bundles_post_ra>
